<compile_context>
chip_gen: v6e
topology: v6e:2x2x1
jax: 0.10.0
libtpu: 0.0.40
codegen_flags: <defaults>
</compile_context>

<pallas_src>
import functools

import jax
import jax.numpy as jnp
from jax.experimental import pallas as pl
from jax.experimental.pallas import tpu as pltpu

EPS = 1e-5


def _round_up(x, m):
    return ((x + m - 1) // m) * m


def _vmem_capacity_bytes():
    try:
        return int(pltpu.get_tpu_info().vmem_capacity_bytes)
    except Exception:
        return 64 << 20  # conservative: v7x per-TensorCore VMEM


def _conv_stats_kernel(x_ref, xh_ref, w_ref, m_ref, y_ref, psum_ref, psq_ref,
                       *, wp, ts):
    """One (batch, cout-block, spatial-tile) step.

    x_ref : (1, Cin_pad, TS)        bf16  current flat padded-activation tile
    xh_ref: (1, Cin_pad, HALO_PAD)  bf16  first HALO_PAD lanes of the *next* tile
    w_ref : (TCout, K)              bf16  conv weights, K = 9*Cin_pad, (kh,kw,cin)
    m_ref : (1, TS)                 f32   validity mask (1 = real output position)
    y_ref : (1, TCout, TS)          bf16  conv output tile (lane-dense)
    psum_ref/psq_ref: (1,1,1,TCout) f32   masked per-channel sum / sum-of-squares
    """
    cur = x_ref[0]                                   # (Cin_pad, TS)
    halo = xh_ref[0]                                 # (Cin_pad, HALO_PAD)
    win = jnp.concatenate([cur, halo], axis=1)       # (Cin_pad, TS + HALO_PAD)

    # 9 static lane-shifted taps -> (9*Cin_pad, TS) patch matrix built in VMEM.
    taps = [win[:, kh * wp + kw: kh * wp + kw + ts]
            for kh in range(3) for kw in range(3)]
    cols = jnp.concatenate(taps, axis=0)             # (K, TS) bf16

    acc = jnp.dot(w_ref[...], cols,
                  preferred_element_type=jnp.float32)  # (TCout, TS) f32 on MXU
    y_ref[...] = acc[None].astype(y_ref.dtype)         # bf16 writeback

    m = m_ref[...]                                   # (1, TS)
    am = acc * m
    psum_ref[...] = jnp.sum(am, axis=1)[None, None, None, :]
    psq_ref[...] = jnp.sum(am * acc, axis=1)[None, None, None, :]


def _bn_relu_kernel(y_ref, scale_ref, shift_ref, o_ref):
    """Global-stat BN affine + ReLU on a lane-dense bf16 tile, f32 out."""
    y = y_ref[...].astype(jnp.float32)               # (1, TCout, TS)
    scale = scale_ref[...][None]                     # (1, TCout, 1)
    shift = shift_ref[...][None]                     # (1, TCout, 1)
    o_ref[...] = jnp.maximum(y * scale + shift, 0.0)


def single_conv_block(x, w, gamma, beta, stride=1, eps=EPS):
    """Forward of SingleConvBlock. x: (N,Cin,H,W) NCHW, w: (Cout,Cin,3,3) OIHW."""
    f32, bf16 = jnp.float32, jnp.bfloat16
    N, Cin, H, W = x.shape
    Cout = w.shape[0]
    Ho = (H - 1) // stride + 1           # (H + 2*1 - 3)//stride + 1
    Wo = (W - 1) // stride + 1
    Hp, Wp = H + 2, W + 2
    Pflat = Hp * Wp

    # --- channel padding: bf16 sublane packing (Cin) and MXU-sized Cout blocks.
    Cin_pad = _round_up(Cin, 16)
    K = 9 * Cin_pad
    if Cout <= 256:
        Cout_pad = _round_up(Cout, 16)
        TCout = Cout_pad
    else:
        Cout_pad = _round_up(Cout, 256)
        TCout = 256
    nCo = Cout_pad // TCout

    halo = 2 * Wp + 2                    # largest flat tap offset (kh=kw=2)
    halo_pad = _round_up(halo, 128)

    # --- VMEM-budget-aware spatial tile size (lanes) + explicit VMEM limit. ----
    def _p1_bytes(t):                    # phase-1 per-step footprint estimate
        return (t * (6 * Cin_pad + 2 * K + 8 * TCout + 8)
                + 6 * Cin_pad * halo_pad + 4 * TCout * K)

    def _p2_bytes(t):                    # phase-2 per-step footprint estimate
        return t * 12 * TCout + 8 * TCout

    cap = _vmem_capacity_bytes()
    budget = int(0.45 * cap)
    ts_cap = min(max(_round_up(Pflat, 128), halo_pad), 8192)
    ts = 128
    for cand in range(ts_cap, 127, -128):
        if max(_p1_bytes(cand), _p2_bytes(cand)) <= budget:
            ts = cand
            break
    ts = max(ts, halo_pad)               # halo slices must fit inside one tile
    nS = -(-Pflat // ts)
    Ppad = nS * ts
    Lx = (nS + 1) * ts                   # one extra zero tile feeds the last halo
    vmem_limit = int(min(0.9 * cap,
                         max(32 << 20, 2.5 * max(_p1_bytes(ts), _p2_bytes(ts)))))

    # --- pad + flatten activations ONCE (a ~1x copy, not a 9x im2col). ---------
    xp = jnp.pad(x, ((0, 0), (0, Cin_pad - Cin), (1, 1), (1, 1))).astype(bf16)
    xf = xp.reshape(N, Cin_pad, Pflat)
    xf = jnp.pad(xf, ((0, 0), (0, 0), (0, Lx - Pflat)))
    # Static halo tiles: first halo_pad lanes of the *next* spatial tile, so the
    # kernel never needs overlapping blocks or dynamic lane slicing.
    xh = xf.reshape(N, Cin_pad, nS + 1, ts)[:, :, 1:, :halo_pad]
    xh = xh.reshape(N, Cin_pad, nS * halo_pad)

    # weights -> (Cout_pad, K), K ordered (kh, kw, cin) to match the kernel taps.
    w_p = jnp.pad(w, ((0, Cout_pad - Cout), (0, Cin_pad - Cin), (0, 0), (0, 0)))
    w_mat = jnp.transpose(w_p, (0, 2, 3, 1)).reshape(Cout_pad, K).astype(bf16)

    # validity mask over flat padded positions (handles stride and lane padding).
    p = jnp.arange(Ppad)
    r, c = p // Wp, p % Wp
    valid = ((p < Pflat)
             & (r % stride == 0) & (r // stride < Ho)
             & (c % stride == 0) & (c // stride < Wo))
    mask = valid.astype(f32).reshape(1, Ppad)

    grid = (N, nCo, nS)
    kernel1 = functools.partial(_conv_stats_kernel, wp=Wp, ts=ts)
    cost = pl.CostEstimate(
        flops=2 * N * Cout_pad * K * Ppad,
        transcendentals=0,
        bytes_accessed=int(2 * nCo * (xf.size + xh.size) + 2 * N * w_mat.size
                           + 2 * N * Cout_pad * Ppad + 4 * Ppad
                           + 8 * N * nS * Cout_pad),
    )

    # --- phase 1: conv (single big-K MXU matmul / tile) + masked BN partials. --
    y_conv, psum, psq = pl.pallas_call(
        kernel1,
        out_shape=(
            jax.ShapeDtypeStruct((N, Cout_pad, Ppad), bf16),
            jax.ShapeDtypeStruct((N, nS, 1, Cout_pad), f32),
            jax.ShapeDtypeStruct((N, nS, 1, Cout_pad), f32),
        ),
        grid=grid,
        in_specs=[
            pl.BlockSpec((1, Cin_pad, ts), lambda n, co, s: (n, 0, s)),
            pl.BlockSpec((1, Cin_pad, halo_pad), lambda n, co, s: (n, 0, s)),
            pl.BlockSpec((TCout, K), lambda n, co, s: (co, 0)),
            pl.BlockSpec((1, ts), lambda n, co, s: (0, s)),
        ],
        out_specs=(
            pl.BlockSpec((1, TCout, ts), lambda n, co, s: (n, co, s)),
            pl.BlockSpec((1, 1, 1, TCout), lambda n, co, s: (n, s, 0, co)),
            pl.BlockSpec((1, 1, 1, TCout), lambda n, co, s: (n, s, 0, co)),
        ),
        compiler_params=pltpu.CompilerParams(
            dimension_semantics=("parallel", "parallel", "arbitrary"),
            vmem_limit_bytes=vmem_limit),
        cost_estimate=cost,
    )(xf, xh, w_mat, mask)

    # --- global (train-mode, biased) batch stats -> per-channel affine. --------
    count = N * Ho * Wo
    s1 = jnp.sum(psum, axis=(0, 1, 2))                    # (Cout_pad,)
    s2 = jnp.sum(psq, axis=(0, 1, 2))
    mean = s1 / count
    # Clamp guards f32 cancellation of E[y^2]-E[y]^2 for strongly biased maps.
    var = jnp.maximum(s2 / count - mean * mean, 0.0)
    inv_std = jax.lax.rsqrt(var + eps)
    g = jnp.pad(gamma.astype(f32), (0, Cout_pad - Cout))
    b = jnp.pad(beta.astype(f32), (0, Cout_pad - Cout))
    scale = (g * inv_std).reshape(Cout_pad, 1)
    shift = (b - mean * g * inv_std).reshape(Cout_pad, 1)

    # --- phase 2: BN affine + ReLU (lane-dense streaming elementwise). ---------
    out_full = pl.pallas_call(
        _bn_relu_kernel,
        out_shape=jax.ShapeDtypeStruct((N, Cout_pad, Ppad), f32),
        grid=grid,
        in_specs=[
            pl.BlockSpec((1, TCout, ts), lambda n, co, s: (n, co, s)),
            pl.BlockSpec((TCout, 1), lambda n, co, s: (co, 0)),
            pl.BlockSpec((TCout, 1), lambda n, co, s: (co, 0)),
        ],
        out_specs=pl.BlockSpec((1, TCout, ts), lambda n, co, s: (n, co, s)),
        compiler_params=pltpu.CompilerParams(
            dimension_semantics=("parallel", "parallel", "parallel"),
            vmem_limit_bytes=vmem_limit),
    )(y_conv, scale, shift)

    # --- extract real channels / spatial positions (NCHW). ---------------------
    out = out_full[:, :Cout, :Pflat].reshape(N, Cout, Hp, Wp)
    out = out[:, :, 0:Ho * stride:stride, 0:Wo * stride:stride]
    return out


def reference(x, w, gamma, beta, stride=1, eps=EPS):
    """Pure-JAX f32 reference matching PyTorch train-mode forward."""
    y = jax.lax.conv_general_dilated(
        x, w, window_strides=(stride, stride), padding=((1, 1), (1, 1)),
        dimension_numbers=("NCHW", "OIHW", "NCHW"))
    mean = jnp.mean(y, axis=(0, 2, 3), keepdims=True)
    var = jnp.mean((y - mean) ** 2, axis=(0, 2, 3), keepdims=True)
    y = (y - mean) * jax.lax.rsqrt(var + eps)
    y = y * gamma[None, :, None, None] + beta[None, :, None, None]
    return jnp.maximum(y, 0.0)


if __name__ == "__main__":
    key = jax.random.PRNGKey(0)
    k_x, k_w, k_g, k_b = jax.random.split(key, 4)

    N, Cin, Cout, H, W = 2, 4, 8, 16, 16
    x = jax.random.normal(k_x, (N, Cin, H, W), jnp.float32)
    w = jax.random.normal(k_w, (Cout, Cin, 3, 3), jnp.float32) * 0.1
    gamma = 1.0 + 0.1 * jax.random.normal(k_g, (Cout,), jnp.float32)
    beta = 0.1 * jax.random.normal(k_b, (Cout,), jnp.float32)

    fwd = jax.jit(single_conv_block)
    out = jax.block_until_ready(fwd(x, w, gamma, beta))

    ref = jax.block_until_ready(reference(x, w, gamma, beta))
    assert out.shape == (N, Cout, H, W), out.shape
    # bf16 matmul operands and bf16 y_conv intermediate (f32 accumulation/affine)
    # => tolerance relaxed vs pure f32.
    err = float(jnp.max(jnp.abs(out - ref)))
    assert err < 5e-2, err

    print("KERNEL_OK")
</pallas_src>

<mosaic_0001>
module attributes {stable_mosaic.version = 11 : i64} {
  func.func @_bn_relu_kernel(%arg0: i32, %arg1: i32, %arg2: i32, %arg3: memref<1x16x384xbf16, #tpu.memory_space<vmem>>, %arg4: memref<16x1xf32, #tpu.memory_space<vmem>>, %arg5: memref<16x1xf32, #tpu.memory_space<vmem>>, %arg6: memref<1x16x384xf32, #tpu.memory_space<vmem>>) attributes {dimension_semantics = [#tpu.dimension_semantics<parallel>, #tpu.dimension_semantics<parallel>, #tpu.dimension_semantics<parallel>], iteration_bounds = array<i64: 2, 1, 1>, scalar_prefetch = 0 : i64, scratch_operands = 0 : i64, tpu.core_type = #tpu.core_type<tc>, window_params = [{transform_indices = @transform_0, window_bounds = array<i64: 1, 16, 384>}, {transform_indices = @transform_1, window_bounds = array<i64: 16, 1>}, {transform_indices = @transform_2, window_bounds = array<i64: 16, 1>}, {transform_indices = @transform_3, window_bounds = array<i64: 1, 16, 384>}]} {
    %c0 = arith.constant 0 : index
    %c0_0 = arith.constant 0 : index
    %c0_1 = arith.constant 0 : index
    %0 = vector.load %arg3[%c0, %c0_0, %c0_1] : memref<1x16x384xbf16, #tpu.memory_space<vmem>>, vector<1x16x384xbf16>
    %1 = arith.extf %0 : vector<1x16x384xbf16> to vector<1x16x384xf32>
    %c0_2 = arith.constant 0 : index
    %c0_3 = arith.constant 0 : index
    %2 = vector.load %arg4[%c0_2, %c0_3] : memref<16x1xf32, #tpu.memory_space<vmem>>, vector<16x1xf32>
    %3 = vector.shape_cast %2 : vector<16x1xf32> to vector<1x16x1xf32>
    %c0_4 = arith.constant 0 : index
    %c0_5 = arith.constant 0 : index
    %4 = vector.load %arg5[%c0_4, %c0_5] : memref<16x1xf32, #tpu.memory_space<vmem>>, vector<16x1xf32>
    %5 = vector.shape_cast %4 : vector<16x1xf32> to vector<1x16x1xf32>
    %6 = vector.broadcast %3 : vector<1x16x1xf32> to vector<1x16x384xf32>
    %7 = arith.mulf %1, %6 : vector<1x16x384xf32>
    %8 = vector.broadcast %5 : vector<1x16x1xf32> to vector<1x16x384xf32>
    %9 = arith.addf %7, %8 : vector<1x16x384xf32>
    %cst = arith.constant 0.000000e+00 : f32
    %10 = vector.broadcast %cst : f32 to vector<1x16x384xf32>
    %11 = arith.maximumf %9, %10 : vector<1x16x384xf32>
    %c0_6 = arith.constant 0 : index
    %c0_7 = arith.constant 0 : index
    %c0_8 = arith.constant 0 : index
    %12 = vector.load %arg6[%c0_6, %c0_7, %c0_8] : memref<1x16x384xf32, #tpu.memory_space<vmem>>, vector<1x16x384xf32>
    tpu.vector_store %arg6[%c0_6, %c0_7, %c0_8], %11 {strides = array<i32>} : memref<1x16x384xf32, #tpu.memory_space<vmem>>, vector<1x16x384xf32>,
    return
  }
  func.func @transform_0(%arg0: i32, %arg1: i32, %arg2: i32) -> (i32, i32, i32) {
    %c0_i32 = arith.constant 0 : i32
    return %arg0, %arg1, %arg2 : i32, i32, i32
  }
  func.func @transform_1(%arg0: i32, %arg1: i32, %arg2: i32) -> (i32, i32) {
    %c0_i32 = arith.constant 0 : i32
    %c0_i32_0 = arith.constant 0 : i32
    return %arg1, %c0_i32 : i32, i32
  }
  func.func @transform_2(%arg0: i32, %arg1: i32, %arg2: i32) -> (i32, i32) {
    %c0_i32 = arith.constant 0 : i32
    %c0_i32_0 = arith.constant 0 : i32
    return %arg1, %c0_i32 : i32, i32
  }
  func.func @transform_3(%arg0: i32, %arg1: i32, %arg2: i32) -> (i32, i32, i32) {
    %c0_i32 = arith.constant 0 : i32
    return %arg0, %arg1, %arg2 : i32, i32, i32
  }
}

module attributes {stable_mosaic.version = 11 : i64} {
  func.func @_conv_stats_kernel(%arg0: i32, %arg1: i32, %arg2: i32, %arg3: memref<1x16x384xbf16, #tpu.memory_space<vmem>>, %arg4: memref<1x16x128xbf16, #tpu.memory_space<vmem>>, %arg5: memref<16x144xbf16, #tpu.memory_space<vmem>>, %arg6: memref<1x384xf32, #tpu.memory_space<vmem>>, %arg7: memref<1x16x384xbf16, #tpu.memory_space<vmem>>, %arg8: memref<1x1x1x16xf32, #tpu.memory_space<vmem>>, %arg9: memref<1x1x1x16xf32, #tpu.memory_space<vmem>>) attributes {dimension_semantics = [#tpu.dimension_semantics<parallel>, #tpu.dimension_semantics<parallel>, #tpu.dimension_semantics<arbitrary>], iteration_bounds = array<i64: 2, 1, 1>, scalar_prefetch = 0 : i64, scratch_operands = 0 : i64, tpu.core_type = #tpu.core_type<tc>, window_params = [{transform_indices = @transform_0, window_bounds = array<i64: 1, 16, 384>}, {transform_indices = @transform_1, window_bounds = array<i64: 1, 16, 128>}, {transform_indices = @transform_2, window_bounds = array<i64: 16, 144>}, {transform_indices = @transform_3, window_bounds = array<i64: 1, 384>}, {transform_indices = @transform_4, window_bounds = array<i64: 1, 16, 384>}, {transform_indices = @transform_5, window_bounds = array<i64: 1, 1, 1, 16>}, {transform_indices = @transform_6, window_bounds = array<i64: 1, 1, 1, 16>}]} {
    %c0 = arith.constant 0 : index
    %c0_0 = arith.constant 0 : index
    %c0_1 = arith.constant 0 : index
    %0 = vector.load %arg3[%c0, %c0_0, %c0_1] : memref<1x16x384xbf16, #tpu.memory_space<vmem>>, vector<1x16x384xbf16>
    %1 = vector.shape_cast %0 : vector<1x16x384xbf16> to vector<16x384xbf16>
    %c0_2 = arith.constant 0 : index
    %c0_3 = arith.constant 0 : index
    %c0_4 = arith.constant 0 : index
    %2 = vector.load %arg4[%c0_2, %c0_3, %c0_4] : memref<1x16x128xbf16, #tpu.memory_space<vmem>>, vector<1x16x128xbf16>
    %3 = vector.shape_cast %2 : vector<1x16x128xbf16> to vector<16x128xbf16>
    %4 = tpu.concatenate %1, %3 in 1 : vector<16x384xbf16>, vector<16x128xbf16> -> vector<16x512xbf16>
    %5 = vector.extract_strided_slice %4 {offsets = [0, 0], sizes = [16, 384], strides = [1, 1]} : vector<16x512xbf16> to vector<16x384xbf16>
    %6 = vector.extract_strided_slice %4 {offsets = [0, 1], sizes = [16, 384], strides = [1, 1]} : vector<16x512xbf16> to vector<16x384xbf16>
    %7 = vector.extract_strided_slice %4 {offsets = [0, 2], sizes = [16, 384], strides = [1, 1]} : vector<16x512xbf16> to vector<16x384xbf16>
    %8 = vector.extract_strided_slice %4 {offsets = [0, 18], sizes = [16, 384], strides = [1, 1]} : vector<16x512xbf16> to vector<16x384xbf16>
    %9 = vector.extract_strided_slice %4 {offsets = [0, 19], sizes = [16, 384], strides = [1, 1]} : vector<16x512xbf16> to vector<16x384xbf16>
    %10 = vector.extract_strided_slice %4 {offsets = [0, 20], sizes = [16, 384], strides = [1, 1]} : vector<16x512xbf16> to vector<16x384xbf16>
    %11 = vector.extract_strided_slice %4 {offsets = [0, 36], sizes = [16, 384], strides = [1, 1]} : vector<16x512xbf16> to vector<16x384xbf16>
    %12 = vector.extract_strided_slice %4 {offsets = [0, 37], sizes = [16, 384], strides = [1, 1]} : vector<16x512xbf16> to vector<16x384xbf16>
    %13 = vector.extract_strided_slice %4 {offsets = [0, 38], sizes = [16, 384], strides = [1, 1]} : vector<16x512xbf16> to vector<16x384xbf16>
    %14 = tpu.concatenate %5, %6, %7, %8, %9, %10, %11, %12, %13 in 0 : vector<16x384xbf16>, vector<16x384xbf16>, vector<16x384xbf16>, vector<16x384xbf16>, vector<16x384xbf16>, vector<16x384xbf16>, vector<16x384xbf16>, vector<16x384xbf16>, vector<16x384xbf16> -> vector<144x384xbf16>
    %c0_5 = arith.constant 0 : index
    %c0_6 = arith.constant 0 : index
    %15 = vector.load %arg5[%c0_5, %c0_6] : memref<16x144xbf16, #tpu.memory_space<vmem>>, vector<16x144xbf16>
    %cst = arith.constant dense<0.000000e+00> : vector<16x384xf32>
    %16 = tpu.matmul %15, %14, %cst {dimension_numbers = #tpu.dot_dimension_numbers<[1], [0], [0], [1], [0, 0, 1, 1], [], []>} : vector<16x144xbf16>, vector<144x384xbf16>, vector<16x384xf32> -> vector<16x384xf32>
    %17 = vector.shape_cast %16 : vector<16x384xf32> to vector<1x16x384xf32>
    %18 = arith.truncf %17 : vector<1x16x384xf32> to vector<1x16x384xbf16>
    %c0_7 = arith.constant 0 : index
    %c0_8 = arith.constant 0 : index
    %c0_9 = arith.constant 0 : index
    %19 = vector.load %arg7[%c0_7, %c0_8, %c0_9] : memref<1x16x384xbf16, #tpu.memory_space<vmem>>, vector<1x16x384xbf16>
    tpu.vector_store %arg7[%c0_7, %c0_8, %c0_9], %18 {strides = array<i32>} : memref<1x16x384xbf16, #tpu.memory_space<vmem>>, vector<1x16x384xbf16>,
    %c0_10 = arith.constant 0 : index
    %c0_11 = arith.constant 0 : index
    %20 = vector.load %arg6[%c0_10, %c0_11] : memref<1x384xf32, #tpu.memory_space<vmem>>, vector<1x384xf32>
    %21 = vector.broadcast %20 : vector<1x384xf32> to vector<16x384xf32>
    %22 = arith.mulf %16, %21 : vector<16x384xf32>
    %cst_12 = arith.constant dense<0.000000e+00> : vector<16xf32>
    %23 = vector.multi_reduction <add>, %22, %cst_12 [1] : vector<16x384xf32> to vector<16xf32>
    %24 = vector.shape_cast %23 : vector<16xf32> to vector<1x1x1x16xf32>
    %c0_13 = arith.constant 0 : index
    %c0_14 = arith.constant 0 : index
    %c0_15 = arith.constant 0 : index
    %c0_16 = arith.constant 0 : index
    %25 = vector.load %arg8[%c0_13, %c0_14, %c0_15, %c0_16] : memref<1x1x1x16xf32, #tpu.memory_space<vmem>>, vector<1x1x1x16xf32>
    tpu.vector_store %arg8[%c0_13, %c0_14, %c0_15, %c0_16], %24 {strides = array<i32>} : memref<1x1x1x16xf32, #tpu.memory_space<vmem>>, vector<1x1x1x16xf32>,
    %26 = arith.mulf %22, %16 : vector<16x384xf32>
    %cst_17 = arith.constant dense<0.000000e+00> : vector<16xf32>
    %27 = vector.multi_reduction <add>, %26, %cst_17 [1] : vector<16x384xf32> to vector<16xf32>
    %28 = vector.shape_cast %27 : vector<16xf32> to vector<1x1x1x16xf32>
    %c0_18 = arith.constant 0 : index
    %c0_19 = arith.constant 0 : index
    %c0_20 = arith.constant 0 : index
    %c0_21 = arith.constant 0 : index
    %29 = vector.load %arg9[%c0_18, %c0_19, %c0_20, %c0_21] : memref<1x1x1x16xf32, #tpu.memory_space<vmem>>, vector<1x1x1x16xf32>
    tpu.vector_store %arg9[%c0_18, %c0_19, %c0_20, %c0_21], %28 {strides = array<i32>} : memref<1x1x1x16xf32, #tpu.memory_space<vmem>>, vector<1x1x1x16xf32>,
    return
  }
  func.func @transform_0(%arg0: i32, %arg1: i32, %arg2: i32) -> (i32, i32, i32) {
    %c0_i32 = arith.constant 0 : i32
    %c0_i32_0 = arith.constant 0 : i32
    return %arg0, %c0_i32, %arg2 : i32, i32, i32
  }
  func.func @transform_1(%arg0: i32, %arg1: i32, %arg2: i32) -> (i32, i32, i32) {
    %c0_i32 = arith.constant 0 : i32
    %c0_i32_0 = arith.constant 0 : i32
    return %arg0, %c0_i32, %arg2 : i32, i32, i32
  }
  func.func @transform_2(%arg0: i32, %arg1: i32, %arg2: i32) -> (i32, i32) {
    %c0_i32 = arith.constant 0 : i32
    %c0_i32_0 = arith.constant 0 : i32
    return %arg1, %c0_i32 : i32, i32
  }
  func.func @transform_3(%arg0: i32, %arg1: i32, %arg2: i32) -> (i32, i32) {
    %c0_i32 = arith.constant 0 : i32
    %c0_i32_0 = arith.constant 0 : i32
    return %c0_i32, %arg2 : i32, i32
  }
  func.func @transform_4(%arg0: i32, %arg1: i32, %arg2: i32) -> (i32, i32, i32) {
    %c0_i32 = arith.constant 0 : i32
    return %arg0, %arg1, %arg2 : i32, i32, i32
  }
  func.func @transform_5(%arg0: i32, %arg1: i32, %arg2: i32) -> (i32, i32, i32, i32) {
    %c0_i32 = arith.constant 0 : i32
    %c0_i32_0 = arith.constant 0 : i32
    return %arg0, %arg2, %c0_i32, %arg1 : i32, i32, i32, i32
  }
  func.func @transform_6(%arg0: i32, %arg1: i32, %arg2: i32) -> (i32, i32, i32, i32) {
    %c0_i32 = arith.constant 0 : i32
    %c0_i32_0 = arith.constant 0 : i32
    return %arg0, %arg2, %c0_i32, %arg1 : i32, i32, i32, i32
  }
}

</mosaic_0001>

<bundles_post_ra>
// kernel: single_conv_block.3
= control target key start
LH: loop header
LB: loop body
LE: loop exit
PB: predicated region body
PF: predicated region fallthrough
CT: control target
= control target key end

     0   :  { %s581_s12 = smov 0   ;;  %s583_s13 = smov 0   ;;  %s626_s0 = inlined_call_operand.vmem [shape: bf16[2,16,384], index: 0, kind: input, shape index: {}]   ;;  %s627_s1 = inlined_call_operand.vmem [shape: f32[16,1], index: 1, kind: input, shape index: {}]   ;;  %s628_s2 = inlined_call_operand.vmem [shape: f32[16,1], index: 2, kind: input, shape index: {}]   ;;  %s629_s3 = inlined_call_operand.vmem [shape: f32[2,16,384], index: 3, kind: output, shape index: {}]  }
   0x1   :  { %s585_s14 = smov 0  }
   0x2 LB: > { %s32_s15 = sadd.s32 1, %s554_s13  ;;  %p502_p0 = scmp.ge.s32.totalorder %s558_s14, 1  ;;  %s558_s14 = sphi %s585_s14, %s13_s14   ;;  %s554_s13 = sphi %s583_s13, %s631_s13   ;;  %s550_s12 = sphi %s581_s12, %s630_s12  }
   0x3   : > { %p34_p1 = scmp.ge.s32.totalorder %s32_s15, 2  ;;  %p197_p2 = scmp.lt.s32.totalorder %s558_s14, 3 }
   0x5   : > { %s633_s15 = smov (%p34_p1, %s32_s15), 0  ;;  %p198_p3 = pnand %p502_p0, %p197_p2 }
   0x6   : > { %p251_p4 = scmp.lt.s32.totalorder (!%p198_p3), %s550_s12, 1 }
   0x7   : > { %201 = sbr.rel (%p198_p3) target bundleno = 150 (0x96), region = 32 }
   0xc   : > { %v305_v0 = vld [vmem:[%s628_s2] sm:$0xff]  ;;  %v560_v2 = vmov 0   ;;  %v306_v3 = vld [vmem:[%s628_s2 + $0x8] sm:$0xff]  ;;  %s635_s12 = smov (!%p251_p4, %s550_s12), 1 }
   0xd   : > { %v303_v1 = vld [vmem:[%s627_s1] sm:$0xff]  ;;  %535 = vset.pattern.permute.xlu1 %v560_v2  ;;  %534 = vset.pattern.permute.xlu0 %v560_v2  ;;  %v304_v4 = vld [vmem:[%s627_s1 + $0x8] sm:$0xff]  ;;  %s507_s24 = smul.u32 24, %s635_s12 }
   0xe   : > { %325 = vperm.xlu1 %535, %v305_v0   ;;  %309 = vperm.xlu0 %534, %v303_v1   ;;  %s508_s28 = smul.u32 48, %s635_s12 }
   0xf   : > { %s262_s27 = scalar_lea.vmem %s626_s0, %s507_s24 }
  0x10   : > { %v293_v5 = vld [vmem:[%s262_s27] sm:$0xff]  ;;  %v294_v6 = vld [vmem:[%s262_s27 + $0x8] ss:$12 sps:$4 sm:$0xff]   ;;  %v295_v10 = vld [vmem:[%s262_s27 + $0xc] sm:$0xff]  ;;  %s290_s4 = scalar_lea.vmem %s629_s3, %s508_s28 }
  0x11   : > { %v297_v7 = vunpack.c.l.bf16 %v293_v5  ;;  %v298_v8 = vunpack.c.h.bf16 %v293_v5  ;;  %v299_v9 = vunpack.c.l.bf16 %v294_v6  ;;  %v300_v16 = vunpack.c.l.bf16 %v295_v10 }
  0x12   : > { %330 = vperm.xlu1 %535, %v306_v3   ;;  %314 = vperm.xlu0 %534, %v304_v4   ;;  %v301_v17 = vunpack.c.h.bf16 %v295_v10  ;;  %v302_v18 = vunpack.c.h.bf16 %v294_v6 }
  0x89   : > { %v326_v11 = vpop.permute.xlu1 %325  ;;  %v310_v12 = vpop.permute.xlu0 %309 }
  0x8a   : > { %v317_v13 = vmul.f32 %v310_v12, %v297_v7  ;;  %v318_v14 = vmul.f32 %v310_v12, %v298_v8  ;;  %v319_v15 = vmul.f32 %v310_v12, %v299_v9 }
  0x8c   : > { %v333_v19 = vadd.f32 %v326_v11, %v317_v13  ;;  %v334_v20 = vadd.f32 %v326_v11, %v318_v14  ;;  %v335_v21 = vadd.f32 %v326_v11, %v319_v15 }
  0x8d   : > { %v315_v22 = vpop.permute.xlu0 %314  ;;  %v331_v27 = vpop.permute.xlu1 %330 }
  0x8e   : > { %v339_v23 = vmax.f32 %v333_v19, 0.0  ;;  %v340_v24 = vmax.f32 %v334_v20, 0.0  ;;  %v341_v25 = vmax.f32 %v335_v21, 0.0  ;;  %v320_v26 = vmul.f32 %v315_v22, %v300_v16 }
  0x8f   : > { %v321_v28 = vmul.f32 %v315_v22, %v301_v17  ;;  %v322_v29 = vmul.f32 %v315_v22, %v302_v18 }
  0x90   : > { %345 = vst [vmem:[%s290_s4] sm:$0xff] %v339_v23  ;;  %346 = vst [vmem:[%s290_s4 + $0x8] sm:$0xff] %v340_v24  ;;  %v336_v30 = vadd.f32 %v331_v27, %v320_v26 }
  0x91   : > { %347 = vst [vmem:[%s290_s4 + $0x10] sm:$0xff] %v341_v25  ;;  %v337_v31 = vadd.f32 %v331_v27, %v321_v28  ;;  %v338_v32 = vadd.f32 %v331_v27, %v322_v29 }
  0x92   : > { %v342_v33 = vmax.f32 %v336_v30, 0.0 }
  0x93   : > { %v343_v34 = vmax.f32 %v337_v31, 0.0  ;;  %v344_v35 = vmax.f32 %v338_v32, 0.0 }
  0x94   : > { %348 = vst [vmem:[%s290_s4 + $0x18] sm:$0xff] %v342_v33 }
  0x95   : > { %349 = vst [vmem:[%s290_s4 + $0x20] sm:$0xff] %v343_v34  ;;  %350 = vst [vmem:[%s290_s4 + $0x28] sm:$0xff] %v344_v35 }
  0x96 PF: > { %s13_s14 = sadd.s32 1, %s558_s14   ;;  %s630_s12 = smov %s554_s13 }
  0x97   : > { %p10_p5 = scmp.ge.s32.totalorder %s13_s14, 4   ;;  %s631_s13 = smov %s633_s15 }
  0x99   :  { %12 = sbr.rel (!%p10_p5) target bundleno = 2 (0x2), region = 68 }

// kernel: single_conv_block.2
= control target key start
LH: loop header
LB: loop body
LE: loop exit
PB: predicated region body
PF: predicated region fallthrough
CT: control target
= control target key end

     0   :  { %s1237_s21 = smov 0   ;;  %s1239_s22 = smov 0   ;;  %s1393_s0 = inlined_call_operand.vmem [shape: bf16[2,16,768], index: 0, kind: input, shape index: {}]   ;;  %s1394_s1 = inlined_call_operand.vmem [shape: bf16[2,16,128], index: 1, kind: input, shape index: {}]   ;;  %s1395_s2 = inlined_call_operand.vmem [shape: bf16[16,144], index: 2, kind: input, shape index: {}]   ;;  %s1396_s3 = inlined_call_operand.vmem [shape: f32[1,384], index: 3, kind: input, shape index: {}]   ;;  %s1397_s4 = inlined_call_operand.vmem [shape: bf16[2,16,384], index: 4, kind: output, shape index: {0}]   ;;  %s1398_s5 = inlined_call_operand.vmem [shape: f32[2,1,1,16], index: 5, kind: output, shape index: {1}]   ;;  %s1399_s6 = inlined_call_operand.vmem [shape: f32[2,1,1,16], index: 6, kind: output, shape index: {2}]  }
   0x1   :  { %s1241_s23 = smov 0   ;;  %s1243_s24 = smov 0  }
   0x2   :  { %s1245_s25 = smov 0  }
   0x3 LB: > { %s36_s26 = sadd.s32 1, %s1187_s24  ;;  %p52_p1 = scmp.ne.s32.totalorder %s1179_s22, %s1175_s21  ;;  %s1191_s25 = sphi %s1245_s25, %s17_s25   ;;  %s1187_s24 = sphi %s1243_s24, %s1403_s24   ;;  %s1183_s23 = sphi %s1241_s23, %s1402_s23   ;;  %s1179_s22 = sphi %s1239_s22, %s1401_s22   ;;  %s1175_s21 = sphi %s1237_s21, %s1400_s21  }
   0x4   : > { %p38_p0 = scmp.ge.s32.totalorder %s36_s26, 2  ;;  %p53_p2 = scmp.eq.s32.totalorder %s1191_s25, 0 }
   0x5   : > { %s45_s28 = sadd.s32 1, %s1179_s22  ;;  %p1063_p5 = scmp.ge.s32.totalorder %s1191_s25, 2 }
   0x6   : > { %s1405_s26 = smov (%p38_p0, %s36_s26), 0  ;;  %p54_p3 = por %p53_p2, %p52_p1 }
   0x7   : > { %s40_s27 = ssub.s32 %s1187_s24, %s1405_s26  ;;  %266 = sbr.rel (%p1063_p5) target bundleno = 19 (0x13), region = 24 }
   0x8   : > { %p43_p4 = scmp.eq.s32.totalorder %s40_s27, 0 }
   0xa   : > { %s1272_s29 = scalar_select %p43_p4, %s1179_s22, %s45_s28  }
   0xc   : > { %269 = sbr.rel (!%p54_p3) target bundleno = 19 (0x13), region = 28  ;;  %s271_s30 = sand.u32 (%p54_p3), 1, %s1179_s22  }
   0xd   : > { %s1093_s7 = smul.u32 (%p54_p3), 48, %s1187_s24 }
   0xe   : > { %s1092_s8 = smul.u32 (%p54_p3), 24, %s271_s30 }
   0xf   : > { %s278_s11 = scalar_lea.vmem (%p54_p3), %s1393_s0, %s1093_s7 }
  0x10   : > { %v293_v0 = vld [vmem:[%s278_s11] sm:$0xff] (%p54_p3)  ;;  %v295_v1 = vld [vmem:[%s278_s11 + $0x18] sm:$0xff] (%p54_p3)  ;;  %v1065_v2 = vld [vmem:[%s278_s11 + $0x8] sm:$0xf] (%p54_p3)  ;;  %s273_s12 = scalar_lea.vmem (%p54_p3), [#allocation2], %s1092_s8 }
  0x11   : > { %294 = vst [vmem:[%s273_s12] sm:$0xff] %v293_v0  ;;  %296 = vst [vmem:[%s273_s12 + $0xc] sm:$0xff] %v295_v1  ;;  %v1067_v3 = vld [vmem:[%s278_s11 + $0x20] sm:$0xf] }
  0x12   : > { %1066 = vst [vmem:[%s273_s12 + $0x8] sm:$0xf] %v1065_v2  ;;  %1068 = vst [vmem:[%s273_s12 + $0x14] sm:$0xf] %v1067_v3 }
  0x13 PF: > { %p1069_p6 = scmp.ge.s32.totalorder %s1191_s25, 1  ;;  %p324_p7 = scmp.lt.s32.totalorder %s1191_s25, 3 }
  0x15   : > { %p325_p8 = pnand %p1069_p6, %p324_p7 }
  0x16   : > { %s331_s13 = sand.u32 (!%p325_p8), 1, %s1175_s21   ;;  %p406_p9 = scmp.lt.s32.totalorder (!%p325_p8), %s1183_s23, 1 }
  0x17   : > { %328 = sbr.rel (%p325_p8) target bundleno = 560 (0x230), region = 58  ;;  %s1193_s16 = smov (!%p325_p8), 91  }
  0x18   : > { %s1094_s14 = smul.u32 (!%p325_p8), 24, %s331_s13  ;;  %s1195_s21 = smov (!%p325_p8), 92  }
  0x19   : > { %s1196_s27 = smov (!%p325_p8), 108   ;;  %s1197_s28 = smov (!%p325_p8), 109  }
  0x1a   : > { %s333_s15 = scalar_lea.vmem (!%p325_p8), [#allocation2], %s1094_s14  ;;  %s1198_s30 = smov (!%p325_p8), 110  }
  0x1b   : > { %s1199_s7 = smov (!%p325_p8), 126   ;;  %s1200_s8 = smov (!%p325_p8), 127  }
  0x1c   : > { %v1284_v4 = vld [vmem:[%s333_s15 + $0x4] ss:$12 sps:$4 sm:$0xff]   ;;  %s1407_s23 = smov (!%p406_p9, %s1183_s23), 1  ;;  %v1289_v5 = vld [vmem:[%s333_s15] ss:$12 sps:$4 sm:$0xff]   ;;  %v1194_v7 = vmov 0   ;;  %v733_v3 = vlaneseq }
  0x1d   : > { %580 = vrot.lane.b32.xlu0 %v1284_v4, %s1193_s16  ;;  %v1292_v6 = vld [vmem:[%s333_s15 + $0x8] ss:$12 sps:$4 sm:$0xff]   ;;  %s1087_s17 = sshll.u32 %s1407_s23, 3  ;;  %578 = vrot.lane.b32.xlu1 %v1289_v5, %s1193_s16  ;;  %vm619_vm0 = vcmask 130048   ;;  %s1201_s11 = smov 90   ;;  %vm586_vm1 = vcmask 744448  }
  0x1e   : > { %s413_s20 = scalar_lea.vmem %s1394_s1, %s1087_s17  ;;  %666 = vmatprep.subr.bf16.mxu1 %v1194_v7  ;;  %v1152_v9 = vld [vmem:[%s1395_s2 + $0x4] ss:$8 sps:$4 sm:$0xff]   ;;  %vm571_vm2 = vcmask 752640   ;;  %vm556_vm3 = vcmask 883712   ;;  %vm541_vm4 = vcmask 891904   ;;  %vm526_vm5 = vcmask 900096  }
  0x1f   : > { %v1149_v8 = vld [vmem:[%s413_s20] sm:$0xff]   ;;  %1079 = vmatprep.mubr.msk.bf16.mxu0 %vm619_vm0, %v1152_v9  ;;  %1080 = vmatprep.mubr.msk.bf16.mxu1 %vm619_vm0, %v1152_v9  ;;  %vm511_vm6 = vcmask 1031168   ;;  %vm496_vm7 = vcmask 1039360   ;;  %vm601_vm8 = vcmask 736256   ;;  %vm775_vm9 = vcmask 130112  }
  0x20   : > { %v1150_v0 = vld [vmem:[%s1395_s2] ss:$8 sps:$4 sm:$0xff]   ;;  %vm778_vm10 = vcmask 122880  }
  0x21   : > { %582 = vrot.lane.b32.xlu0 %v1292_v6, %s1193_s16  ;;  %565 = vrot.lane.b32.xlu1 %v1284_v4, %s1195_s21 }
  0x25   : > { %567 = vrot.lane.b32.xlu0 %v1292_v6, %s1195_s21  ;;  %563 = vrot.lane.b32.xlu1 %v1289_v5, %s1195_s21 }
  0x29   : > { %584 = vrot.lane.b32.xlu0 %v1149_v8, %s1193_s16  ;;  %550 = vrot.lane.b32.xlu1 %v1284_v4, %s1196_s27  ;;  %s1095_s16 = smul.u32 24, %s1407_s23 }
  0x2b   : > { %s439_s19 = scalar_lea.vmem %s1397_s4, %s1095_s16 }
  0x2d   : > { %552 = vrot.lane.b32.xlu0 %v1292_v6, %s1196_s27  ;;  %548 = vrot.lane.b32.xlu1 %v1289_v5, %s1196_s27 }
  0x31   : > { %569 = vrot.lane.b32.xlu0 %v1149_v8, %s1195_s21  ;;  %535 = vrot.lane.b32.xlu1 %v1284_v4, %s1197_s28 }
  0x35   : > { %537 = vrot.lane.b32.xlu0 %v1292_v6, %s1197_s28  ;;  %533 = vrot.lane.b32.xlu1 %v1289_v5, %s1197_s28 }
  0x39   : > { %554 = vrot.lane.b32.xlu0 %v1149_v8, %s1196_s27  ;;  %520 = vrot.lane.b32.xlu1 %v1284_v4, %s1198_s30  ;;  %s450_s27 = scalar_lea.vmem %s1398_s5, %s1407_s23 }
  0x3d   : > { %522 = vrot.lane.b32.xlu0 %v1292_v6, %s1198_s30  ;;  %518 = vrot.lane.b32.xlu1 %v1289_v5, %s1198_s30 }
  0x41   : > { %539 = vrot.lane.b32.xlu0 %v1149_v8, %s1197_s28  ;;  %505 = vrot.lane.b32.xlu1 %v1284_v4, %s1199_s7 }
  0x45   : > { %507 = vrot.lane.b32.xlu0 %v1292_v6, %s1199_s7  ;;  %503 = vrot.lane.b32.xlu1 %v1289_v5, %s1199_s7 }
  0x49   : > { %524 = vrot.lane.b32.xlu0 %v1149_v8, %s1198_s30  ;;  %490 = vrot.lane.b32.xlu1 %v1284_v4, %s1200_s8 }
  0x4d   : > { %492 = vrot.lane.b32.xlu0 %v1292_v6, %s1200_s8  ;;  %488 = vrot.lane.b32.xlu1 %v1289_v5, %s1200_s8 }
  0x51   : > { %509 = vrot.lane.b32.xlu0 %v1149_v8, %s1199_s7  ;;  %494 = vrot.lane.b32.xlu1 %v1149_v8, %s1200_s8  ;;  %s459_s7 = scalar_lea.vmem %s1399_s6, %s1407_s23 }
  0x55   : > { %595 = vrot.lane.b32.xlu0 %v1284_v4, %s1201_s11  ;;  %597 = vrot.lane.b32.xlu1 %v1292_v6, %s1201_s11 }
  0x59   : > { %593 = vrot.lane.b32.xlu0 %v1289_v5, %s1201_s11  ;;  %599 = vrot.lane.b32.xlu1 %v1149_v8, %s1201_s11  ;;  %v731_v8 = vld [vmem:[%s1396_s3] sm:$0x7] }
  0x8f   : > { %v581_v10 = vpop.permute.xlu0 %580  ;;  %v579_v11 = vpop.permute.xlu1 %578 }
  0x90   : > { %v587_v15 = vsel %vm586_vm1, %v579_v11, %v581_v10 }
  0x93   : > { %v583_v12 = vpop.permute.xlu0 %582  ;;  %v566_v13 = vpop.permute.xlu1 %565 }
  0x94   : > { %v588_v14 = vsel %vm586_vm1, %v581_v10, %v583_v12 }
  0x95   : > { %623 = vmatprep.subr.bf16.mxu0 %v588_v14 }
  0x96   : > { %624 = vmatpush1.bf16.msra.mxu0 %v587_v15 }
  0x97   : > { %v568_v16 = vpop.permute.xlu0 %567  ;;  %v564_v17 = vpop.permute.xlu1 %563 }
  0x98   : > { %v573_v18 = vsel %vm571_vm2, %v566_v13, %v568_v16  ;;  %v572_v19 = vsel %vm571_vm2, %v564_v17, %v566_v13 }
  0x99   : > { %625 = vmatprep.subr.bf16.mxu0 %v573_v18 }
  0x9a   : > { %626 = vmatpush1.bf16.msra.mxu0 %v572_v19 }
  0x9b   : > { %v585_v20 = vpop.permute.xlu0 %584  ;;  %v551_v21 = vpop.permute.xlu1 %550 }
  0x9c   : > { %v589_v22 = vsel %vm586_vm1, %v583_v12, %v585_v20 }
  0x9d   : > { %667 = vmatpush1.bf16.msra.mxu1 %v589_v22 }
  0x9e   : > { %668 = vmatprep.subr.bf16.mxu1 %v1194_v7 }
  0x9f   : > { %v553_v23 = vpop.permute.xlu0 %552  ;;  %v549_v24 = vpop.permute.xlu1 %548 }
  0xa0   : > { %v558_v25 = vsel %vm556_vm3, %v551_v21, %v553_v23  ;;  %v557_v26 = vsel %vm556_vm3, %v549_v24, %v551_v21 }
  0xa1   : > { %627 = vmatprep.subr.bf16.mxu0 %v558_v25 }
  0xa2   : > { %628 = vmatpush1.bf16.msra.mxu0 %v557_v26 }
  0xa3   : > { %v570_v27 = vpop.permute.xlu0 %569  ;;  %v536_v28 = vpop.permute.xlu1 %535 }
  0xa4   : > { %v574_v29 = vsel %vm571_vm2, %v568_v16, %v570_v27 }
  0xa5   : > { %669 = vmatpush1.bf16.msra.mxu1 %v574_v29 }
  0xa6   : > { %670 = vmatprep.subr.bf16.mxu1 %v1194_v7 }
  0xa7   : > { %v538_v30 = vpop.permute.xlu0 %537  ;;  %v534_v31 = vpop.permute.xlu1 %533 }
  0xa8   : > { %v543_v32 = vsel %vm541_vm4, %v536_v28, %v538_v30  ;;  %v542_v33 = vsel %vm541_vm4, %v534_v31, %v536_v28 }
  0xa9   : > { %629 = vmatprep.subr.bf16.mxu0 %v543_v32 }
  0xaa   : > { %630 = vmatpush1.bf16.msra.mxu0 %v542_v33 }
  0xab   : > { %v555_v34 = vpop.permute.xlu0 %554  ;;  %v521_v35 = vpop.permute.xlu1 %520 }
  0xac   : > { %v559_v36 = vsel %vm556_vm3, %v553_v23, %v555_v34 }
  0xad   : > { %671 = vmatpush1.bf16.msra.mxu1 %v559_v36 }
  0xae   : > { %672 = vmatprep.subr.bf16.mxu1 %v1194_v7 }
  0xaf   : > { %v523_v37 = vpop.permute.xlu0 %522  ;;  %v519_v38 = vpop.permute.xlu1 %518 }
  0xb0   : > { %v528_v39 = vsel %vm526_vm5, %v521_v35, %v523_v37  ;;  %v527_v40 = vsel %vm526_vm5, %v519_v38, %v521_v35 }
  0xb1   : > { %631 = vmatprep.subr.bf16.mxu0 %v528_v39 }
  0xb2   : > { %632 = vmatpush1.bf16.msra.mxu0 %v527_v40 }
  0xb3   : > { %v540_v41 = vpop.permute.xlu0 %539  ;;  %v506_v42 = vpop.permute.xlu1 %505 }
  0xb4   : > { %v544_v43 = vsel %vm541_vm4, %v538_v30, %v540_v41 }
  0xb5   : > { %673 = vmatpush1.bf16.msra.mxu1 %v544_v43 }
  0xb6   : > { %674 = vmatprep.subr.bf16.mxu1 %v1194_v7 }
  0xb7   : > { %v508_v44 = vpop.permute.xlu0 %507  ;;  %v504_v45 = vpop.permute.xlu1 %503 }
  0xb8   : > { %v513_v46 = vsel %vm511_vm6, %v506_v42, %v508_v44  ;;  %v512_v47 = vsel %vm511_vm6, %v504_v45, %v506_v42 }
  0xb9   : > { %633 = vmatprep.subr.bf16.mxu0 %v513_v46 }
  0xba   : > { %634 = vmatpush1.bf16.msra.mxu0 %v512_v47 }
  0xbb   : > { %v525_v48 = vpop.permute.xlu0 %524  ;;  %v491_v49 = vpop.permute.xlu1 %490 }
  0xbc   : > { %v529_v50 = vsel %vm526_vm5, %v523_v37, %v525_v48 }
  0xbd   : > { %675 = vmatpush1.bf16.msra.mxu1 %v529_v50 }
  0xbe   : > { %676 = vmatprep.subr.bf16.mxu1 %v1194_v7 }
  0xbf   : > { %v493_v51 = vpop.permute.xlu0 %492  ;;  %v489_v52 = vpop.permute.xlu1 %488 }
  0xc0   : > { %v498_v53 = vsel %vm496_vm7, %v491_v49, %v493_v51  ;;  %v497_v54 = vsel %vm496_vm7, %v489_v52, %v491_v49 }
  0xc1   : > { %635 = vmatprep.subr.bf16.mxu0 %v498_v53 }
  0xc2   : > { %636 = vmatpush1.bf16.msra.mxu0 %v497_v54 }
  0xc3   : > { %v510_v55 = vpop.permute.xlu0 %509  ;;  %637 = vmatprep.subr.bf16.mxu0 %v1284_v4  ;;  %v495_v56 = vpop.permute.xlu1 %494  ;;  %v734_v4 = vshrl.u32 %v733_v3, 7 }
  0xc4   : > { %v514_v57 = vsel %vm511_vm6, %v508_v44, %v510_v55  ;;  %v499_v60 = vsel %vm496_vm7, %v493_v51, %v495_v56  ;;  %v765_v44 = vand.u32 127, %v733_v3 }
  0xc5   : > { %677 = vmatpush1.bf16.msra.mxu1 %v514_v57  ;;  %v739_v9 = vsub.s32 1, %v734_v4  ;;  %v743_v10 = vsub.s32 2, %v734_v4 }
  0xc6   : > { %638 = vmatpush1.bf16.msra.mxu0 %v1289_v5  ;;  %678 = vmatprep.subr.bf16.mxu1 %v1194_v7  ;;  %v735_v5 = vsub.s32 0, %v734_v4  ;;  %v770_v45 = vadd.s32 4294967288, %v765_v44  ;;  %v768_v46 = vsub.s32 %v765_v44, %v734_v4 }
  0xc7   : > { %v596_v58 = vpop.permute.xlu0 %595  ;;  %v598_v59 = vpop.permute.xlu1 %597  ;;  %v740_v12 = vrot.slane %v731_v8, %v739_v9  ;;  %v744_v13 = vrot.slane %v731_v8, %v743_v10 }
  0xc8   : > { %v603_v61 = vsel %vm601_vm8, %v596_v58, %v598_v59  ;;  %v736_v11 = vrot.slane %v731_v8, %v735_v5  ;;  %v773_v48 = vsub.s32 %v770_v45, %v734_v4 }
  0xc9   : > { %679 = vmatpush1.bf16.msra.mxu1 %v499_v60  ;;  %653 = vmatprep.subr.bf16.mxu0 %v603_v61 }
  0xca   : > { %680 = vmatprep.subr.bf16.mxu1 %v1194_v7 }
  0xcb   : > { %v594_v62 = vpop.permute.xlu0 %593  ;;  %v600_v1 = vpop.permute.xlu1 %599 }
  0xcc   : > { %v602_v63 = vsel %vm601_vm8, %v594_v62, %v596_v58  ;;  %v604_v2 = vsel %vm601_vm8, %v598_v59, %v600_v1 }
  0xcd   : > { %654 = vmatpush2.bf16.msra.mxu0 %v602_v63  ;;  %681 = vmatpush1.bf16.msra.mxu1 %v1292_v6 }
  0xce   : > { %696 = vmatprep.subr.bf16.mxu1 %v1194_v7 }
  0xd0   : > { %656 = vmatmul.mubr.bf16.vlgmr.msra.gmra.mxu0 %v1150_v0 }
  0xd1   : > { %697 = vmatpush2.bf16.msra.mxu1 %v604_v2 }
  0xd4   : > { %699 = vmatmul.mubr.bf16.vlgmr.msra.gmra.mxu1 %v1150_v0 }
 0x190   : > { %v657_v6 = vpop.f32.mrf.mxu0 }
 0x191   : > { %v748_v7 = vmul.f32 %v736_v11, %v657_v6 }
 0x192   : > { %v659_v14 = vpop.f32.mrf.mxu0 }
 0x193   : > { %v1088_v15 = vpack.c.bf16 %v659_v14, %v657_v6  ;;  %v749_v16 = vmul.f32 %v740_v12, %v659_v14  ;;  %v780_v22 = vmul.f32 %v748_v7, %v657_v6 }
 0x194   : > { %v661_v17 = vpop.f32.mrf.mxu0  ;;  %v700_v18 = vpop.f32.mrf.mxu1 }
 0x195   : > { %727 = vst [vmem:[%s439_s19] sm:$0xff] %v1088_v15  ;;  %v781_v19 = vmul.f32 %v749_v16, %v659_v14  ;;  %v1089_v20 = vpack.c.bf16 %v700_v18, %v700_v18  ;;  %v750_v21 = vmul.f32 %v744_v13, %v700_v18  ;;  %v751_v23 = vmul.f32 %v736_v11, %v661_v17 }
 0x196   : > { %v663_v24 = vpop.f32.mrf.mxu0  ;;  %v702_v25 = vpop.f32.mrf.mxu1  ;;  %v754_v26 = vadd.f32 %v749_v16, %v748_v7 }
 0x197   : > { %728 = vst [vmem:[%s439_s19 + $0x8] sm:$0xf] %v1089_v20  ;;  %v1090_v27 = vpack.c.bf16 %v663_v24, %v661_v17  ;;  %v752_v28 = vmul.f32 %v740_v12, %v663_v24  ;;  %v782_v31 = vmul.f32 %v750_v21, %v700_v18  ;;  %v786_v32 = vadd.f32 %v781_v19, %v780_v22 }
 0x198   : > { %v703_v29 = vpop.f32.mrf.mxu1  ;;  %v755_v30 = vadd.f32 %v754_v26, %v750_v21  ;;  %v783_v37 = vmul.f32 %v751_v23, %v661_v17 }
 0x199   : > { %729 = vst [vmem:[%s439_s19 + $0xc] sm:$0xff] %v1090_v27  ;;  %v784_v33 = vmul.f32 %v752_v28, %v663_v24  ;;  %v1091_v34 = vpack.c.bf16 %v703_v29, %v703_v29  ;;  %v753_v35 = vmul.f32 %v744_v13, %v703_v29  ;;  %v758_v36 = vadd.f32 %v752_v28, %v751_v23 }
 0x19a   : > { %756 = vadd.xlane.f32.xlu0 %v755_v30  ;;  %v705_v38 = vpop.f32.mrf.mxu1  ;;  %v787_v40 = vadd.f32 %v786_v32, %v782_v31 }
 0x19b   : > { %730 = vst [vmem:[%s439_s19 + $0x14] sm:$0xf] %v1091_v34  ;;  %v759_v39 = vadd.f32 %v758_v36, %v753_v35  ;;  %v785_v41 = vmul.f32 %v753_v35, %v703_v29  ;;  %v790_v42 = vadd.f32 %v784_v33, %v783_v37 }
 0x19d   : > { %760 = vadd.xlane.f32.xlu1 %v759_v39  ;;  %v791_v43 = vadd.f32 %v790_v42, %v785_v41 }
 0x19e   : > { %788 = vadd.xlane.f32.xlu0 %v787_v40 }
 0x1a2   : > { %792 = vadd.xlane.f32.xlu0 %v791_v43 }
 0x223   : > { %v757_v47 = vpop.xlane.xlu0 %756 }
 0x224   : > { %v769_v50 = vrot.slane %v757_v47, %v768_v46 }
 0x226   : > { %v761_v49 = vpop.xlane.xlu1 %760 }
 0x227   : > { %v789_v51 = vpop.xlane.xlu0 %788  ;;  %v774_v52 = vrot.slane %v761_v49, %v773_v48 }
 0x228   : > { %v799_v55 = vrot.slane %v789_v51, %v768_v46 }
 0x229   : > { %v776_v53 = vsel %vm775_vm9, %v774_v52, %v769_v50 }
 0x22a   : > { %779 = vst.msk [vmem:[%s450_s27] sm:$0x1] %vm778_vm10, %v776_v53 }
 0x22b   : > { %v793_v54 = vpop.xlane.xlu0 %792 }
 0x22c   : > { %v803_v56 = vrot.slane %v793_v54, %v773_v48 }
 0x22e   : > { %v804_v57 = vsel %vm775_vm9, %v803_v56, %v799_v55 }
 0x22f   : > { %806 = vst.msk [vmem:[%s459_s7] sm:$0x1] %vm778_vm10, %v804_v57 }
 0x230 PF: > { %s17_s25 = sadd.s32 1, %s1191_s25   ;;  %s1400_s21 = smov %s1179_s22 }
 0x231   : > { %p14_p10 = scmp.ge.s32.totalorder %s17_s25, 4   ;;  %s1401_s22 = smov %s1272_s29 }
 0x232   : > { %s1402_s23 = smov %s1187_s24  ;;  %s1403_s24 = smov %s1405_s26 }
 0x233   :  { %16 = sbr.rel (!%p14_p10) target bundleno = 3 (0x3), region = 136 }

</bundles_post_ra>
